<compile_context>
chip_gen: v6e
topology: v6e:2x2x1
jax: 0.10.0
libtpu: 0.0.40
codegen_flags: <defaults>
</compile_context>

<pallas_src>
import jax
import jax.numpy as jnp
from jax import lax
from jax.experimental import pallas as pl
from jax.experimental.pallas import tpu as pltpu

# Contract last dim of lhs with last dim of rhs:  (M, D) x (N, D) -> (M, N)
_CONTRACT_LAST = (((1,), (1,)), ((), ()))


def _attn_kernel(xq_ref, xkv_ref, wq_ref, wk_ref, wv_ref, o_ref, acc_ref, q_ref):
    """One (batch, q-tile, kv-tile) grid step.

    xq_ref : (1, tq,  D)   query-side slab of X
    xkv_ref: (1, tkv, D)   key/value-side slab of X
    w*_ref : (D, D)        Linear weights (torch layout: out = x @ W^T)
    o_ref  : (1, tq,  D)   output tile (resident across the kv axis)
    acc_ref: (tq, D) f32   VMEM accumulator
    q_ref  : (tq, D)       VMEM-cached projected q tile
    """
    kv = pl.program_id(2)

    @pl.when(kv == 0)
    def _init():
        acc_ref[...] = jnp.zeros_like(acc_ref)
        # q = X_q @ Wq^T  (contract feature dims; no transpose materialized)
        q = lax.dot_general(
            xq_ref[0], wq_ref[...],
            dimension_numbers=_CONTRACT_LAST,
            preferred_element_type=jnp.float32,
        )
        q_ref[...] = q.astype(q_ref.dtype)

    x_kv = xkv_ref[0]                                         # (tkv, D)
    k = lax.dot_general(
        x_kv, wk_ref[...],
        dimension_numbers=_CONTRACT_LAST,
        preferred_element_type=jnp.float32,
    ).astype(x_kv.dtype)                                      # (tkv, D)
    v = lax.dot_general(
        x_kv, wv_ref[...],
        dimension_numbers=_CONTRACT_LAST,
        preferred_element_type=jnp.float32,
    ).astype(x_kv.dtype)                                      # (tkv, D)

    # scores tile: q @ k^T  -> (tq, tkv), bounded VMEM, f32 accumulate on MXU
    s = lax.dot_general(
        q_ref[...], k,
        dimension_numbers=_CONTRACT_LAST,
        preferred_element_type=jnp.float32,
    )

    # y partial: scores @ v, accumulated in f32 VMEM scratch (no per-kv DMA)
    acc_ref[...] += jnp.dot(
        s.astype(x_kv.dtype), v, preferred_element_type=jnp.float32
    )

    @pl.when(kv == pl.num_programs(2) - 1)
    def _finalize():
        o_ref[0] = acc_ref[...].astype(o_ref.dtype)


def _pick_tile(extent: int) -> int:
    # Prefer MXU-friendly tiles (256 for v6e/v7x, 128 for v5e); whole extent
    # for small sequences (block == full dim is always legal).
    for t in (256, 128):
        if extent >= t and extent % t == 0:
            return t
    return extent


def single_head_attention(x: jax.Array,
                          wq: jax.Array,
                          wk: jax.Array,
                          wv: jax.Array,
                          softmax_enabled: bool = False) -> jax.Array:
    """Pallas TPU implementation of SingleHeadAttention.forward.

    x: (B, T, D);  wq/wk/wv: (D, D) torch-Linear weights (out = x @ W^T).
    `softmax_enabled` is accepted for interface parity but — exactly like the
    torch module's forward — is never applied.
    Returns (B, T, D) in x.dtype.
    """
    del softmax_enabled  # unused in the reference forward pass
    B, T, D = x.shape
    tq = _pick_tile(T)
    tkv = _pick_tile(T)
    n_q = T // tq
    n_kv = T // tkv

    return pl.pallas_call(
        _attn_kernel,
        out_shape=jax.ShapeDtypeStruct((B, T, D), x.dtype),
        grid_spec=pltpu.PrefetchScalarGridSpec(
            num_scalar_prefetch=0,
            grid=(B, n_q, n_kv),
            in_specs=[
                pl.BlockSpec((1, tq, D), lambda b, qi, ki: (b, qi, 0)),   # X (q side)
                pl.BlockSpec((1, tkv, D), lambda b, qi, ki: (b, ki, 0)),  # X (kv side)
                pl.BlockSpec((D, D), lambda b, qi, ki: (0, 0)),           # Wq
                pl.BlockSpec((D, D), lambda b, qi, ki: (0, 0)),           # Wk
                pl.BlockSpec((D, D), lambda b, qi, ki: (0, 0)),           # Wv
            ],
            out_specs=pl.BlockSpec((1, tq, D), lambda b, qi, ki: (b, qi, 0)),
            scratch_shapes=[
                pltpu.VMEM((tq, D), jnp.float32),   # output accumulator
                pltpu.VMEM((tq, D), x.dtype),       # cached projected q tile
            ],
        ),
        compiler_params=pltpu.CompilerParams(
            dimension_semantics=("parallel", "parallel", "arbitrary"),
        ),
    )(x, x, wq, wk, wv)


def _reference(x, wq, wk, wv):
    q = jnp.einsum("btd,od->bto", x, wq)
    k = jnp.einsum("btd,od->bto", x, wk)
    v = jnp.einsum("btd,od->bto", x, wv)
    dot = jnp.einsum("btd,bkd->btk", q, k)
    return jnp.einsum("btk,bkd->btd", dot, v)


if __name__ == "__main__":
    key = jax.random.PRNGKey(0)
    kx, kq, kk, kv = jax.random.split(key, 4)
    B, T, D = 2, 8, 32   # batch=2, seq=8, hidden=32

    x = jax.random.normal(kx, (B, T, D), dtype=jnp.float32)
    wq = jax.random.normal(kq, (D, D), dtype=jnp.float32) / jnp.sqrt(D)
    wk = jax.random.normal(kk, (D, D), dtype=jnp.float32) / jnp.sqrt(D)
    wv = jax.random.normal(kv, (D, D), dtype=jnp.float32) / jnp.sqrt(D)

    y = jax.block_until_ready(single_head_attention(x, wq, wk, wv))
    y_ref = _reference(x, wq, wk, wv)

    if jnp.allclose(y, y_ref, atol=1e-2, rtol=1e-2):
        print("KERNEL_OK")
    else:
        print("MISMATCH: max abs err =", float(jnp.max(jnp.abs(y - y_ref))))
</pallas_src>

<mosaic_0001>
module attributes {stable_mosaic.version = 11 : i64} {
  func.func @_attn_kernel(%arg0: i32, %arg1: i32, %arg2: i32, %arg3: memref<1x8x32xf32, #tpu.memory_space<vmem>>, %arg4: memref<1x8x32xf32, #tpu.memory_space<vmem>>, %arg5: memref<32x32xf32, #tpu.memory_space<vmem>>, %arg6: memref<32x32xf32, #tpu.memory_space<vmem>>, %arg7: memref<32x32xf32, #tpu.memory_space<vmem>>, %arg8: memref<1x8x32xf32, #tpu.memory_space<vmem>>, %arg9: memref<8x32xf32, #tpu.memory_space<vmem>>, %arg10: memref<8x32xf32, #tpu.memory_space<vmem>>) attributes {dimension_semantics = [#tpu.dimension_semantics<parallel>, #tpu.dimension_semantics<parallel>, #tpu.dimension_semantics<arbitrary>], iteration_bounds = array<i64: 2, 1, 1>, scalar_prefetch = 0 : i64, scratch_operands = 2 : i64, tpu.core_type = #tpu.core_type<tc>, window_params = [{transform_indices = @transform_0, window_bounds = array<i64: 1, 8, 32>}, {transform_indices = @transform_1, window_bounds = array<i64: 1, 8, 32>}, {pipeline_mode = #tpu.pipeline_mode<synchronous>, transform_indices = @transform_2, window_bounds = array<i64: 32, 32>}, {pipeline_mode = #tpu.pipeline_mode<synchronous>, transform_indices = @transform_3, window_bounds = array<i64: 32, 32>}, {pipeline_mode = #tpu.pipeline_mode<synchronous>, transform_indices = @transform_4, window_bounds = array<i64: 32, 32>}, {transform_indices = @transform_5, window_bounds = array<i64: 1, 8, 32>}]} {
    %c0_i32 = arith.constant 0 : i32
    %0 = arith.cmpi eq, %arg2, %c0_i32 : i32
    %1 = arith.extui %0 : i1 to i32
    %c0_i32_0 = arith.constant 0 : i32
    %2 = arith.cmpi ne, %1, %c0_i32_0 : i32
    scf.if %2 {
      %cst_18 = arith.constant 0.000000e+00 : f32
      %18 = vector.broadcast %cst_18 : f32 to vector<8x32xf32>
      %c0_19 = arith.constant 0 : index
      %c0_20 = arith.constant 0 : index
      %19 = vector.load %arg9[%c0_19, %c0_20] : memref<8x32xf32, #tpu.memory_space<vmem>>, vector<8x32xf32>
      tpu.vector_store %arg9[%c0_19, %c0_20], %18 {strides = array<i32>} : memref<8x32xf32, #tpu.memory_space<vmem>>, vector<8x32xf32>,
      %c0_21 = arith.constant 0 : index
      %c0_22 = arith.constant 0 : index
      %c0_23 = arith.constant 0 : index
      %20 = vector.load %arg3[%c0_21, %c0_22, %c0_23] : memref<1x8x32xf32, #tpu.memory_space<vmem>>, vector<1x8x32xf32>
      %21 = vector.shape_cast %20 : vector<1x8x32xf32> to vector<8x32xf32>
      %c0_24 = arith.constant 0 : index
      %c0_25 = arith.constant 0 : index
      %22 = vector.load %arg5[%c0_24, %c0_25] : memref<32x32xf32, #tpu.memory_space<vmem>>, vector<32x32xf32>
      %cst_26 = arith.constant dense<0.000000e+00> : vector<8x32xf32>
      %23 = tpu.matmul %21, %22, %cst_26 {dimension_numbers = #tpu.dot_dimension_numbers<[1], [1], [0], [0], [0, 0, 1, 0], [], []>} : vector<8x32xf32>, vector<32x32xf32>, vector<8x32xf32> -> vector<8x32xf32>
      %c0_27 = arith.constant 0 : index
      %c0_28 = arith.constant 0 : index
      %24 = vector.load %arg10[%c0_27, %c0_28] : memref<8x32xf32, #tpu.memory_space<vmem>>, vector<8x32xf32>
      tpu.vector_store %arg10[%c0_27, %c0_28], %23 {strides = array<i32>} : memref<8x32xf32, #tpu.memory_space<vmem>>, vector<8x32xf32>,
    } else {
    }
    %c0 = arith.constant 0 : index
    %c0_1 = arith.constant 0 : index
    %c0_2 = arith.constant 0 : index
    %3 = vector.load %arg4[%c0, %c0_1, %c0_2] : memref<1x8x32xf32, #tpu.memory_space<vmem>>, vector<1x8x32xf32>
    %4 = vector.shape_cast %3 : vector<1x8x32xf32> to vector<8x32xf32>
    %c0_3 = arith.constant 0 : index
    %c0_4 = arith.constant 0 : index
    %5 = vector.load %arg6[%c0_3, %c0_4] : memref<32x32xf32, #tpu.memory_space<vmem>>, vector<32x32xf32>
    %cst = arith.constant dense<0.000000e+00> : vector<8x32xf32>
    %6 = tpu.matmul %4, %5, %cst {dimension_numbers = #tpu.dot_dimension_numbers<[1], [1], [0], [0], [0, 0, 1, 0], [], []>} : vector<8x32xf32>, vector<32x32xf32>, vector<8x32xf32> -> vector<8x32xf32>
    %c0_5 = arith.constant 0 : index
    %c0_6 = arith.constant 0 : index
    %7 = vector.load %arg7[%c0_5, %c0_6] : memref<32x32xf32, #tpu.memory_space<vmem>>, vector<32x32xf32>
    %cst_7 = arith.constant dense<0.000000e+00> : vector<8x32xf32>
    %8 = tpu.matmul %4, %7, %cst_7 {dimension_numbers = #tpu.dot_dimension_numbers<[1], [1], [0], [0], [0, 0, 1, 0], [], []>} : vector<8x32xf32>, vector<32x32xf32>, vector<8x32xf32> -> vector<8x32xf32>
    %c0_8 = arith.constant 0 : index
    %c0_9 = arith.constant 0 : index
    %9 = vector.load %arg10[%c0_8, %c0_9] : memref<8x32xf32, #tpu.memory_space<vmem>>, vector<8x32xf32>
    %cst_10 = arith.constant dense<0.000000e+00> : vector<8x8xf32>
    %10 = tpu.matmul %9, %6, %cst_10 {dimension_numbers = #tpu.dot_dimension_numbers<[1], [1], [0], [0], [0, 0, 1, 0], [], []>} : vector<8x32xf32>, vector<8x32xf32>, vector<8x8xf32> -> vector<8x8xf32>
    %c0_11 = arith.constant 0 : index
    %c0_12 = arith.constant 0 : index
    %11 = vector.load %arg9[%c0_11, %c0_12] : memref<8x32xf32, #tpu.memory_space<vmem>>, vector<8x32xf32>
    %cst_13 = arith.constant dense<0.000000e+00> : vector<8x32xf32>
    %12 = tpu.matmul %10, %8, %cst_13 {dimension_numbers = #tpu.dot_dimension_numbers<[1], [0], [0], [1], [0, 0, 1, 1], [], []>} : vector<8x8xf32>, vector<8x32xf32>, vector<8x32xf32> -> vector<8x32xf32>
    %13 = arith.addf %11, %12 : vector<8x32xf32>
    %c0_14 = arith.constant 0 : index
    %c0_15 = arith.constant 0 : index
    %14 = vector.load %arg9[%c0_14, %c0_15] : memref<8x32xf32, #tpu.memory_space<vmem>>, vector<8x32xf32>
    tpu.vector_store %arg9[%c0_14, %c0_15], %13 {strides = array<i32>} : memref<8x32xf32, #tpu.memory_space<vmem>>, vector<8x32xf32>,
    %c0_i32_16 = arith.constant 0 : i32
    %15 = arith.cmpi eq, %arg2, %c0_i32_16 : i32
    %16 = arith.extui %15 : i1 to i32
    %c0_i32_17 = arith.constant 0 : i32
    %17 = arith.cmpi ne, %16, %c0_i32_17 : i32
    scf.if %17 {
      %c0_18 = arith.constant 0 : index
      %c0_19 = arith.constant 0 : index
      %18 = vector.load %arg9[%c0_18, %c0_19] : memref<8x32xf32, #tpu.memory_space<vmem>>, vector<8x32xf32>
      %c0_20 = arith.constant 0 : index
      %c0_21 = arith.constant 0 : index
      %c0_22 = arith.constant 0 : index
      %19 = vector.load %arg8[%c0_20, %c0_21, %c0_22] : memref<1x8x32xf32, #tpu.memory_space<vmem>>, vector<1x8x32xf32>
      %20 = vector.shape_cast %19 : vector<1x8x32xf32> to vector<8x32xf32>
      %21 = vector.shape_cast %18 : vector<8x32xf32> to vector<1x8x32xf32>
      tpu.vector_store %arg8[%c0_20, %c0_21, %c0_22], %21 {strides = array<i32>} : memref<1x8x32xf32, #tpu.memory_space<vmem>>, vector<1x8x32xf32>,
    } else {
    }
    return
  }
  func.func @transform_0(%arg0: i32, %arg1: i32, %arg2: i32) -> (i32, i32, i32) {
    %c0_i32 = arith.constant 0 : i32
    %c0_i32_0 = arith.constant 0 : i32
    return %arg0, %arg1, %c0_i32 : i32, i32, i32
  }
  func.func @transform_1(%arg0: i32, %arg1: i32, %arg2: i32) -> (i32, i32, i32) {
    %c0_i32 = arith.constant 0 : i32
    %c0_i32_0 = arith.constant 0 : i32
    return %arg0, %arg2, %c0_i32 : i32, i32, i32
  }
  func.func @transform_2(%arg0: i32, %arg1: i32, %arg2: i32) -> (i32, i32) {
    %c0_i32 = arith.constant 0 : i32
    %c0_i32_0 = arith.constant 0 : i32
    %c0_i32_1 = arith.constant 0 : i32
    return %c0_i32, %c0_i32_0 : i32, i32
  }
  func.func @transform_3(%arg0: i32, %arg1: i32, %arg2: i32) -> (i32, i32) {
    %c0_i32 = arith.constant 0 : i32
    %c0_i32_0 = arith.constant 0 : i32
    %c0_i32_1 = arith.constant 0 : i32
    return %c0_i32, %c0_i32_0 : i32, i32
  }
  func.func @transform_4(%arg0: i32, %arg1: i32, %arg2: i32) -> (i32, i32) {
    %c0_i32 = arith.constant 0 : i32
    %c0_i32_0 = arith.constant 0 : i32
    %c0_i32_1 = arith.constant 0 : i32
    return %c0_i32, %c0_i32_0 : i32, i32
  }
  func.func @transform_5(%arg0: i32, %arg1: i32, %arg2: i32) -> (i32, i32, i32) {
    %c0_i32 = arith.constant 0 : i32
    %c0_i32_0 = arith.constant 0 : i32
    return %arg0, %arg1, %c0_i32 : i32, i32, i32
  }
}

</mosaic_0001>

<bundles_post_ra>
// kernel: tpu_custom_call.1
= control target key start
LH: loop header
LB: loop body
LE: loop exit
PB: predicated region body
PF: predicated region fallthrough
CT: control target
= control target key end

     0   :  { %s1645_s0 = inlined_call_operand.hbm [shape: f32[2,8,32], index: 0, kind: input, shape index: {}]   ;;  %s1646_s1 = inlined_call_operand.hbm [shape: f32[2,8,32], index: 1, kind: input, shape index: {}]   ;;  %s1647_s2 = inlined_call_operand.hbm [shape: f32[32,32], index: 2, kind: input, shape index: {}]   ;;  %s1648_s3 = inlined_call_operand.hbm [shape: f32[32,32], index: 3, kind: input, shape index: {}]   ;;  %s1649_s4 = inlined_call_operand.hbm [shape: f32[32,32], index: 4, kind: input, shape index: {}]   ;;  %s1650_s5 = inlined_call_operand.hbm [shape: f32[2,8,32], index: 5, kind: output, shape index: {}]  }
   0x1   :  { %1653 = sst [smem:[#allocation19_spill]] %s1645_s0 }
   0x2   :  { %1654 = sst [smem:[#allocation20_spill]] %s1647_s2 }
   0x3   :  { %1655 = sst [smem:[#allocation21_spill]] %s1648_s3 }
   0x4   :  { %10 = vsyncpa [#allocation5], 0 }
   0x5   :  { %12 = vsyncpa [#allocation5 + $0x1], 0 }
   0x6   :  { %13 = vsyncpa [#allocation8], 0 }
   0x7   :  { %15 = vsyncpa [#allocation8 + $0x1], 0 }
   0x8   :  { %16 = vsyncpa [#allocation11], 0 }
   0x9   :  { %17 = vsyncpa [#allocation6], 0 }
   0xa   :  { %19 = vsyncpa [#allocation6 + $0x1], 0  ;;  %s1402_s18 = smov 0   ;;  %s1404_s19 = smov 0  }
   0xb   :  { %s1406_s20 = smov 0   ;;  %s1408_s21 = smov 0  }
   0xc   :  { %s1410_s22 = smov 0   ;;  %s1412_s23 = smov 0  }
   0xd LB: > { %s1433_s24 = sadd.s32 4294967295, %s1360_s23   ;;  %s931_s25 = sadd.s32 4294967294, %s1360_s23   ;;  %s1360_s23 = sphi %s1412_s23, %s25_s23   ;;  %s1356_s22 = sphi %s1410_s22, %s1677_s22   ;;  %s1352_s21 = sphi %s1408_s21, %s1676_s21   ;;  %s1348_s20 = sphi %s1406_s20, %s1675_s20   ;;  %s1344_s19 = sphi %s1404_s19, %s1674_s19   ;;  %s1340_s18 = sphi %s1402_s18, %s1673_s18  }
   0xe   : > { %p66_p0 = scmp.ne.s32.totalorder %s1344_s19, %s1340_s18  ;;  %p1651_p1 = scmp.eq.s32.totalorder %s1433_s24, 0 }
   0xf   : > { %p189_p3 = scmp.eq.s32.totalorder %s931_s25, 1  ;;  %p932_p5 = scmp.ge.s32.totalorder %s1360_s23, 1 }
  0x10   : > { %p1442_p4 = por %p1651_p1, %p66_p0  ;;  %p196_p7 = scmp.lt.s32.totalorder %s1360_s23, 3 }
  0x11   : > { %p1447_p6 = por %p189_p3, %p66_p0  ;;  %s1362_s29 = smov [#allocation9]  }
  0x12   : > { %s1656_s26 = scalar_select %p1442_p4, 1, 0 }
  0x13   : > { %s1657_s27 = scalar_select %p1447_p6, 1, 0 }
  0x14   : > { %p1452_p8 = pnand %p932_p5, %p196_p7  ;;  %s208_s30 = sshll.u32 %s1362_s29, 4  ;;  %s209_s30 = int_to_ptr.vmem [resolvable:$true] %s208_s30 }
  0x15   : > { %s1363_s7 = smov [#allocation10]   ;;  %s1364_s9 = smov [#allocation12]  }
  0x16   : > { %p1050_p9 = pneg %p1452_p8  ;;  %s221_s8 = sshll.u32 %s1363_s7, 4  ;;  %s222_s8 = int_to_ptr.vmem [resolvable:$true] %s221_s8 }
  0x17   : > { %s234_s10 = sshll.u32 %s1364_s9, 4  ;;  %s1145_s11 = scalar_lea.vmem %s209_s30, 512  ;;  %s235_s10 = int_to_ptr.vmem [resolvable:$true] %s234_s10 }
  0x18   : > { %p1461_p11 = pnand %p1050_p9, %p1651_p1  ;;  %p1146_p13 = scmp.ne.s32.totalorder %s209_s30, %s1145_s11 }
  0x19   : > { %p1153_p5 = scmp.lt.s32.totalorder %s209_s30, %s209_s30  ;;  %p1154_p7 = scmp.lt.s32.totalorder %s1145_s11, %s1145_s11 }
  0x1a   : > { %p1136_p12 = pneg %p1461_p11 }
  0x1b   : > { %p1155_p9 = por %p1154_p7, %p1153_p5 }
  0x1c   : > { %p1148_p0 = pnand %p1146_p13, %p1136_p12 }
  0x1e   : > { %p1149_p3 = pneg %p1148_p0 }
  0x20   : > { %p1156_p10 = pnand %p1155_p9, %p1149_p3 }
  0x22   : > { %1159 = shalt.err (!%p1156_p10)
}
  0x23   : > { %s1365_s12 = smov 128   ;;  %s1366_s13 = smov 8  }
  0x24   : > { %s1660_s2 = sld [smem:[#allocation20_spill]]  ;;  %s1171_s16 = scalar_lea.vmem %s222_s8, 512 }
  0x25   : > { %p1172_p1 = scmp.ne.s32.totalorder %s222_s8, %s1171_s16  ;;  %p1179_p2 = scmp.lt.s32.totalorder %s222_s8, %s222_s8 }
  0x26   : > { %p1180_p6 = scmp.lt.s32.totalorder %s1171_s16, %s1171_s16 }
  0x27   : > { %p1174_p13 = pnand %p1172_p1, %p1136_p12 }
  0x28   : > { %p1181_p5 = por %p1180_p6, %p1179_p2 }
  0x29   : > { %p1175_p0 = pneg %p1174_p13 }
  0x2a   : > { %1053 = dma.hbm_to_vmem [thread:$0]  (!%p1461_p11), %s1660_s2, 512, %s209_s30, [#allocation8], %s1365_s12, %s1365_s12, %s1366_s13  }
  0x2b   : > { %p1182_p3 = pnand %p1181_p5, %p1175_p0 }
  0x2d   : > { %1185 = shalt.err (!%p1182_p3)
}
  0x2e   : > { %s1661_s3 = sld [smem:[#allocation21_spill]]  ;;  %s1197_s29 = scalar_lea.vmem %s235_s10, 512 }
  0x2f   : > { %p1198_p10 = scmp.ne.s32.totalorder %s235_s10, %s1197_s29  ;;  %p1205_p9 = scmp.lt.s32.totalorder %s235_s10, %s235_s10 }
  0x30   : > { %p1206_p13 = scmp.lt.s32.totalorder %s1197_s29, %s1197_s29 }
  0x31   : > { %p1200_p7 = pnand %p1198_p10, %p1136_p12 }
  0x32   : > { %p1207_p4 = por %p1206_p13, %p1205_p9 }
  0x33   : > { %p1201_p1 = pneg %p1200_p7 }
  0x34   : > { %1056 = dma.hbm_to_vmem [thread:$0]  (!%p1461_p11), %s1661_s3, 512, %s222_s8, [#allocation11], %s1365_s12, %s1365_s12, %s1366_s13  }
  0x35   : > { %p1208_p2 = pnand %p1207_p4, %p1201_p1 }
  0x37   : > { %1211 = shalt.err (!%p1208_p2)
}
  0x38   : > { %1059 = dma.hbm_to_vmem [thread:$0]  (!%p1461_p11), %s1649_s4, 512, %s235_s10, [#allocation11], %s1365_s12, %s1365_s12, %s1366_s13  }
  0x39   : > { %s53_s8 = sadd.s32 1, %s1348_s20  ;;  %s44_s9 = sadd.s32 1, %s1356_s22 }
  0x3a   : > { %p60_p4 = scmp.ne.s32.totalorder %s1348_s20, %s1344_s19  ;;  %p46_p6 = scmp.ge.s32.totalorder %s44_s9, 2 }
  0x3b   : > { %p61_p12 = scmp.eq.s32.totalorder %s1360_s23, 0  ;;  %p1662_p0 = scmp.eq.s32.totalorder %s1433_s24, 1 }
  0x3c   : > { %p1074_p3 = scmp.lt.s32.totalorder %s1360_s23, 2  ;;  %s1679_s9 = smov (%p46_p6, %s44_s9), 0 }
  0x3d   : > { %p1498_p5 = por %p1662_p0, %p60_p4  ;;  %p62_p10 = por %p61_p12, %p60_p4 }
  0x3e   : > { %s248_s11 = sand.u32 1, %s1348_s20   ;;  %s48_s14 = ssub.s32 %s1356_s22, %s1679_s9 }
  0x3f   : > { %p51_p11 = scmp.eq.s32.totalorder %s48_s14, 0  ;;  %s937_s10 = sshll.u32 %s248_s11, 3 }
  0x40   : > { %s938_s12 = sshll.u32 %s1356_s22, 7  ;;  %s1664_s0 = sld [smem:[#allocation19_spill]] }
  0x41   : > { %s1510_s13 = scalar_select %p51_p11, %s1348_s20, %s53_s8  }
  0x42   : > { %s252_s25 = scalar_lea.vmem [#allocation4], %s937_s10  ;;  %p1517_p7 = pnand %p1074_p3, %p62_p10 }
  0x43   : > { %s260_s29 = sshll.u32 %s252_s25, 4  ;;  %s1524_s14 = scalar_lea.hbm %s1646_s1, %s938_s12  ;;  %s261_s29 = int_to_ptr.vmem [resolvable:$true] %s260_s29 }
  0x44   : > { %s267_s8 = sand.u32 1, %s1360_s23   ;;  %s249_s3 = scalar_lea.sflag [#allocation5], %s248_s11 }
  0x45   : > { %p1214_p1 = pneg %p1517_p7  ;;  %s1225_s15 = scalar_lea.vmem %s261_s29, 128 }
  0x46   : > { %s258_s17 = scalar_lea.hbm %s1664_s0, %s938_s12  ;;  %p1226_p9 = scmp.ne.s32.totalorder %s261_s29, %s1225_s15 }
  0x47   : > { %s1367_s16 = smov [#allocation4]  }
  0x48   : > { %p1228_p13 = pnand %p1226_p9, %p1214_p1  ;;  %s1230_s25 = sshll.u32 %s1367_s16, 4  ;;  %s1231_s25 = int_to_ptr.vmem [resolvable:$false] %s1230_s25 }
  0x49   : > { %s1232_s0 = scalar_lea.vmem %s1231_s25, 256  ;;  %p1233_p4 = scmp.lt.s32.totalorder %s261_s29, %s1231_s25 }
  0x4a   : > { %p1229_p2 = pneg %p1228_p13  ;;  %p1234_p6 = scmp.lt.s32.totalorder %s1232_s0, %s1225_s15 }
  0x4c   : > { %p1235_p12 = por %p1234_p6, %p1233_p4 }
  0x4e   : > { %p1236_p0 = pnand %p1235_p12, %p1229_p2 }
  0x50   : > { %1239 = shalt.err (!%p1236_p0)
}
  0x51   : > { %1063 = dma.hbm_to_vmem [thread:$0]  (!%p1517_p7), %s258_s17, 128, %s261_s29, %s249_s3  }
  0x52   : > { %s271_s2 = scalar_lea.vmem [#allocation7], %s937_s10  ;;  %s268_s12 = scalar_lea.sflag [#allocation8], %s267_s8 }
  0x53   : > { %s279_s11 = sshll.u32 %s271_s2, 4  ;;  %s1368_s16 = smov [#allocation7]   ;;  %s280_s11 = int_to_ptr.vmem [resolvable:$true] %s279_s11 }
  0x54   : > { %s1253_s7 = scalar_lea.vmem %s280_s11, 128  ;;  %s1258_s25 = sshll.u32 %s1368_s16, 4  ;;  %s1259_s25 = int_to_ptr.vmem [resolvable:$false] %s1258_s25 }
  0x55   : > { %p1254_p3 = scmp.ne.s32.totalorder %s280_s11, %s1253_s7  ;;  %s1260_s0 = scalar_lea.vmem %s1259_s25, 256 }
  0x56   : > { %p1261_p9 = scmp.lt.s32.totalorder %s280_s11, %s1259_s25  ;;  %p1262_p13 = scmp.lt.s32.totalorder %s1260_s0, %s1253_s7 }
  0x57   : > { %p1256_p10 = pnand %p1254_p3, %p1214_p1 }
  0x58   : > { %p1263_p2 = por %p1262_p13, %p1261_p9 }
  0x59   : > { %p1257_p11 = pneg %p1256_p10 }
  0x5b   : > { %p1264_p4 = pnand %p1263_p2, %p1257_p11 }
  0x5d   : > { %1267 = shalt.err (!%p1264_p4)
}
  0x5e   : > { %1066 = dma.hbm_to_vmem [thread:$0]  (!%p1517_p7), %s1524_s14, 128, %s280_s11, %s268_s12  }
  0x5f   : > { %288 = sbr.rel (%p1452_p8) target bundleno = 739 (0x2e3), region = 40  ;;  %s1543_s3 = sand.u32 (!%p1452_p8), 1, %s1344_s19  }
  0x60   : > { %s1546_s10 = sshll.u32 (!%p1452_p8), %s1543_s3, 3  ;;  %s291_s17 = scalar_lea.sflag (!%p1452_p8), [#allocation5], %s1543_s3 }
  0x61   : > { %s294_s29 = scalar_lea.vmem (!%p1452_p8), [#allocation4], %s1546_s10  ;;  %p1666_p1 = scmp.ne.s32.totalorder (!%p1452_p8), %s1656_s26, 0 }
  0x64   : > { %1319 = dma.done.wait (%p1666_p1), %s291_s17, 128  }
  0x65   : > { %1321 = vsyncadd (%p1666_p1), %s291_s17, 4294967168  ;;  %s299_s28 = sand.u32 1, %s1433_s24   ;;  %s303_s14 = scalar_lea.vmem [#allocation7], %s1546_s10 }
  0x66   : > { %s300_s30 = scalar_lea.sflag [#allocation8], %s299_s28 }
  0x67   : > { %1323 = dma.done.wait (%p1666_p1), %s300_s30, 128  }
  0x68   : > { %1325 = vsyncadd (%p1666_p1), %s300_s30, 4294967168  ;;  %p1667_p8 = scmp.eq.s32.totalorder %s1433_s24, 0 }
  0x6a   : > { %1327 = dma.done.wait (%p1667_p8), [#allocation8], 512   ;;  %p1668_p7 = pmov %p1667_p8 }
  0x6c   : > { %1329 = vsyncadd (%p1668_p7), [#allocation8], 4294966784  ;;  %p1669_p6 = pmov %p1668_p7 }
  0x6e   : > { %1331 = dma.done.wait (%p1669_p6), [#allocation11], 1024   ;;  %p1670_p12 = pmov %p1669_p6 }
  0x6f   : > { %vm351_vm0 = vcmask 261120   ;;  %v1369_v0 = vmov 0.0   ;;  %vm1370_vm1 = vmmov 0   ;;  %v357_v1 = vld [vmem:[#allocation9 + $0x18] sm:$0xff]  ;;  %v356_v3 = vld [vmem:[#allocation9 + $0x10] sm:$0xff]  ;;  %v355_v5 = vld [vmem:[#allocation9 + $0x8] sm:$0xff] }
  0x70   : > { %1333 = vsyncadd (%p1670_p12), [#allocation11], 4294966272  ;;  %989 = vmatprep.subr.mxu0 %v1369_v0  ;;  %352 = vst.msk [vmem:[#allocation2] sm:$0xff] %vm351_vm0, %v1369_v0  ;;  %1000 = vmatprep.subr.mxu1 %v1369_v0  ;;  %v448_v2 = vld [vmem:[#allocation10 + $0x18] sm:$0xff]  ;;  %v447_v4 = vld [vmem:[#allocation10 + $0x10] sm:$0xff]  ;;  %vm699_vm2 = vcmask 64512  }
  0x71   : > { %997 = vmatprep.mubr.msk.f32.mxu0 %vm1370_vm1, %v1369_v0  ;;  %1008 = vmatprep.mubr.msk.f32.mxu1 %vm1370_vm1, %v1369_v0  ;;  %v446_v6 = vld [vmem:[#allocation10 + $0x8] sm:$0xff]  ;;  %v354_v7 = vld [vmem:[#allocation9] sm:$0xff]  ;;  %v444_v10 = vld [vmem:[%s303_s14] sm:$0xff]  ;;  %s967_s24 = sshll.u32 %s1352_s21, 7  ;;  %s346_s26 = scalar_lea.vmem [#allocation13], %s1546_s10 }
  0x72   : > { %990 = vmatpush3.xpose.msk.msra.mxu0 %vm351_vm0, %v357_v1  ;;  %1001 = vmatpush3.xpose.msk.msra.mxu1 %vm351_vm0, %v448_v2  ;;  %v445_v8 = vld [vmem:[#allocation10] sm:$0xff]  ;;  %v538_v11 = vld [vmem:[#allocation12 + $0x18] sm:$0xff]  ;;  %v537_v12 = vld [vmem:[#allocation12 + $0x10] sm:$0xff]  ;;  %s795_s8 = sshll.u32 %s346_s26, 4  ;;  %s1602_s11 = scalar_lea.hbm %s1650_s5, %s967_s24  ;;  %s796_s8 = int_to_ptr.vmem [resolvable:$true] %s795_s8 }
  0x73   : > { %991 = vmatprep.subr.mxu0 %v1369_v0  ;;  %1002 = vmatprep.subr.mxu1 %v1369_v0  ;;  %v353_v9 = vld [vmem:[%s294_s29] sm:$0xff]  ;;  %s781_s12 = scalar_lea.sflag [#allocation6], %s1543_s3  ;;  %s1268_s7 = scalar_lea.vmem %s796_s8, 128 }
  0x74   : > { %v536_v13 = vld [vmem:[#allocation12 + $0x8] sm:$0xff]  ;;  %v535_v14 = vld [vmem:[#allocation12] sm:$0xff]  ;;  %p1269_p0 = scmp.ne.s32.totalorder %s796_s8, %s1268_s7  ;;  %s1371_s16 = smov [#allocation13]  }
  0x75   : > { %s1272_s25 = sshll.u32 %s1371_s16, 4  ;;  %s1273_s25 = int_to_ptr.vmem [resolvable:$false] %s1272_s25 }
  0x76   : > { %992 = vmatpush3.xpose.msk.msra.mxu0 %vm351_vm0, %v356_v3  ;;  %1003 = vmatpush3.xpose.msk.msra.mxu1 %vm351_vm0, %v447_v4  ;;  %p1270_p3 = pnand %p1269_p0, %p1498_p5  ;;  %s1274_s21 = scalar_lea.vmem %s1273_s25, 256 }
  0x77   : > { %993 = vmatprep.subr.mxu0 %v1369_v0  ;;  %1004 = vmatprep.subr.mxu1 %v1369_v0  ;;  %v698_v24 = vld [vmem:[#allocation2] sm:$0xff]  ;;  %p1275_p11 = scmp.lt.s32.totalorder %s796_s8, %s1273_s25  ;;  %p1276_p9 = scmp.lt.s32.totalorder %s1274_s21, %s1268_s7 }
  0x78   : > { %p1271_p10 = pneg %p1270_p3 }
  0x79   : > { %p1277_p13 = por %p1276_p9, %p1275_p11 }
  0x7a   : > { %994 = vmatpush3.xpose.msk.msra.mxu0 %vm351_vm0, %v355_v5  ;;  %1005 = vmatpush3.xpose.msk.msra.mxu1 %vm351_vm0, %v446_v6 }
  0x7b   : > { %995 = vmatprep.subr.mxu0 %v1369_v0  ;;  %1006 = vmatprep.subr.mxu1 %v1369_v0  ;;  %p1278_p2 = pnand %p1277_p13, %p1271_p10 }
  0x7e   : > { %996 = vmatpush3.xpose.msk.msra.mxu0 %vm351_vm0, %v354_v7  ;;  %1007 = vmatpush3.xpose.msk.msra.mxu1 %vm351_vm0, %v445_v8 }
  0x7f   : > { %1011 = vmatprep.subr.mxu0 %v1369_v0  ;;  %1022 = vmatprep.subr.mxu1 %v1369_v0 }
  0x81   : > { %998 = vmatmul.mubr.msk.f32.vlgmr.msra.gmra.mxu0 %vm351_vm0, %v353_v9  ;;  %1009 = vmatmul.mubr.msk.f32.vlgmr.msra.gmra.mxu1 %vm351_vm0, %v444_v10 }
  0x82   : > { %1012 = vmatpush3.xpose.msk.msra.mxu0 %vm351_vm0, %v538_v11  ;;  %1019 = vmatprep.mubr.msk.f32.mxu0 %vm1370_vm1, %v1369_v0 }
  0x83   : > { %1013 = vmatprep.subr.mxu0 %v1369_v0  ;;  %1024 = vmatprep.mubr.msk.f32.mxu1 %vm1370_vm1, %v1369_v0 }
  0x86   : > { %1014 = vmatpush3.xpose.msk.msra.mxu0 %vm351_vm0, %v537_v12 }
  0x87   : > { %1015 = vmatprep.subr.mxu0 %v1369_v0 }
  0x8a   : > { %1016 = vmatpush3.xpose.msk.msra.mxu0 %vm351_vm0, %v536_v13 }
  0x8b   : > { %1017 = vmatprep.subr.mxu0 %v1369_v0 }
  0x8e   : > { %1018 = vmatpush3.xpose.msk.msra.mxu0 %vm351_vm0, %v535_v14 }
  0x91   : > { %1020 = vmatmul.mubr.msk.f32.vlgmr.msra.gmra.mxu0 %vm351_vm0, %v444_v10 }
 0x141   : > { %v439_v15 = vpop.f32.mrf.mxu0  ;;  %v531_v16 = vpop.f32.mrf.mxu1 }
 0x142   : > { %443 = vst.msk [vmem:[#allocation3] sm:$0xff] %vm351_vm0, %v439_v15  ;;  %1023 = vmatpush3.xpose.msk.msra.mxu1 %vm351_vm0, %v531_v16 }
 0x143   : > { %v999_v17 = vpop.f32.mrf.mxu0  ;;  %v1010_v18 = vpop.f32.mrf.mxu1  ;;  %1027 = vmatprep.subr.mxu1 %v1369_v0 }
 0x149   : > { %v621_v19 = vld [vmem:[#allocation3] sm:$0xff] }
 0x14a   : > { %1025 = vmatmul.mubr.msk.f32.vlgmr.msra.gmra.mxu1 %vm351_vm0, %v621_v19 }
 0x14b   : > { %1029 = vmatprep.mubr.msk.f32.mxu1 %vm1370_vm1, %v1369_v0 }
 0x151   : > { %v617_v20 = vpop.f32.mrf.mxu0 }
 0x152   : > { %1028 = vmatpush3.msra.mxu1 %v617_v20 }
 0x153   : > { %v1021_v21 = vpop.f32.mrf.mxu0 }
 0x20a   : > { %v694_v22 = vpop.f32.mrf.mxu1 }
 0x20b   : > { %1030 = vmatmul.mubr.msk.f32.vlgmr.msra.gmra.mxu1 %vm699_vm2, %v694_v22 }
 0x20c   : > { %v1026_v23 = vpop.f32.mrf.mxu1 }
 0x2cb   : > { %v769_v25 = vpop.f32.mrf.mxu1 }
 0x2cc   : > { %v773_v26 = vadd.f32 %v769_v25, %v698_v24 }
 0x2cd   : > { %v1031_v27 = vpop.f32.mrf.mxu1 }
 0x2ce   : > { %774 = vst.msk [vmem:[#allocation2] sm:$0xff] %vm351_vm0, %v773_v26 }
 0x2d5   : > { %v778_v28 = vld [vmem:[#allocation2] sm:$0xff] }
 0x2d6   : > { %779 = vst.msk [vmem:[%s346_s26] sm:$0xff] %vm351_vm0, %v778_v28 }
 0x2d7   : > { %1281 = shalt.err (!%p1278_p2)
}
 0x2d8   : > { %s1282_s0 = scalar_lea.hbm %s1602_s11, 128  ;;  %s1286_s17 = scalar_lea.hbm %s1650_s5, 256 }
 0x2d9   : > { %p1283_p4 = scmp.ne.s32.totalorder %s1602_s11, %s1282_s0  ;;  %p1287_p7 = scmp.lt.s32.totalorder %s1602_s11, %s1650_s5 }
 0x2da   : > { %p1288_p6 = scmp.lt.s32.totalorder %s1286_s17, %s1282_s0 }
 0x2db   : > { %p1284_p1 = pnand %p1283_p4, %p1498_p5 }
 0x2dc   : > { %p1289_p12 = por %p1288_p6, %p1287_p7 }
 0x2dd   : > { %p1285_p8 = pneg %p1284_p1 }
 0x2df   : > { %p1290_p0 = pnand %p1289_p12, %p1285_p8 }
 0x2e1   : > { %1293 = shalt.err (!%p1290_p0)
}
 0x2e2   : > { %1048 = dma.vmem_to_hbm [thread:$0]  (%p1498_p5), %s796_s8, 128, %s1602_s11, %s781_s12  }
 0x2e3 PF: > { %s807_s30 = sand.u32 1, %s1340_s18   ;;  %p1671_p3 = scmp.ne.s32.totalorder %s1657_s27, 0 }
 0x2e4   : > { %p1672_p10 = scmp.ge.s32.totalorder %s1360_s23, 2  ;;  %s808_s14 = scalar_lea.sflag [#allocation6], %s807_s30 }
 0x2e6   : > { %p1068_p11 = pnand %p1672_p10, %p1671_p3 }
 0x2e8   : > { %p1069_p9 = pneg %p1068_p11 }
 0x2ea   : > { %1335 = dma.done.wait (%p1069_p9), %s808_s14, 128  }
 0x2eb   : > { %1337 = vsyncadd (%p1069_p9), %s808_s14, 4294967168  ;;  %s25_s23 = sadd.s32 1, %s1360_s23   ;;  %s1673_s18 = smov %s1344_s19 }
 0x2ec   : > { %p22_p13 = scmp.ge.s32.totalorder %s25_s23, 4   ;;  %s1674_s19 = smov %s1348_s20 }
 0x2ed   : > { %s1675_s20 = smov %s1510_s13  ;;  %s1676_s21 = smov %s1356_s22 }
 0x2ee   : > { %s1677_s22 = smov %s1679_s9  ;;  %24 = sbr.rel (!%p22_p13) target bundleno = 13 (0xd), region = 118 }
 0x2f3   :  { %813 = vsyncpa [#allocation5], 1 }
 0x2f4   :  { %815 = vsyncpa [#allocation5 + $0x1], 1 }
 0x2f5   :  { %816 = vsyncpa [#allocation8], 1 }
 0x2f6   :  { %818 = vsyncpa [#allocation8 + $0x1], 1 }
 0x2f7   :  { %819 = vsyncpa [#allocation11], 1 }
 0x2f8   :  { %820 = vsyncpa [#allocation6], 1 }
 0x2f9   :  { %822 = vsyncpa [#allocation6 + $0x1], 1 }

</bundles_post_ra>
